<compile_context>
chip_gen: v7x
topology: tpu7x:2x2x1
jax: 0.10.0
libtpu: 0.0.40
codegen_flags: <defaults>
</compile_context>

<pallas_src>
import functools

import jax
import jax.numpy as jnp
from jax.experimental import pallas as pl
from jax.experimental.pallas import tpu as pltpu


def _round_up(a, b):
    return ((a + b - 1) // b) * b


# ---------------------------------------------------------------------------
# Pass 1: pooled stats -> shared MLP -> sigmoid -> + MCIN  => scale (N, 1, C)
# ---------------------------------------------------------------------------
def _gate_kernel(x_ref, w1_ref, b1_ref, w2_ref, b2_ref, mcin_ref,
                 scale_ref, sum_acc, max_acc, *, s_total, tile_s, masked):
    s = pl.program_id(1)
    n_s = pl.num_programs(1)

    @pl.when(s == 0)
    def _init():
        sum_acc[...] = jnp.zeros_like(sum_acc)
        max_acc[...] = jnp.full_like(max_acc, -jnp.inf)

    x = x_ref[...].astype(jnp.float32)                      # (1, C, TS)
    if masked:
        lane = jax.lax.broadcasted_iota(jnp.int32, x.shape, dimension=2)
        valid = (s * tile_s + lane) < s_total
        x_sum = jnp.where(valid, x, 0.0)
        x_max = jnp.where(valid, x, -jnp.inf)
    else:
        x_sum, x_max = x, x

    sum_acc[...] += jnp.sum(x_sum, axis=-1)                 # (1, C)
    max_acc[...] = jnp.maximum(max_acc[...], jnp.max(x_max, axis=-1))

    @pl.when(s == n_s - 1)
    def _finalize():
        avg = sum_acc[...] * (1.0 / float(s_total))         # (1, C) == avg_pool3d
        mx = max_acc[...]                                   # (1, C) == max_pool3d
        # Run the shared MLP once on the stacked [avg; max] matrix.
        pooled = jnp.concatenate([avg, mx], axis=0)         # (2, C)
        w1 = w1_ref[...].astype(jnp.float32)                # (C, Ch)
        b1 = b1_ref[...].astype(jnp.float32)                # (1, Ch)
        w2 = w2_ref[...].astype(jnp.float32)                # (Ch, C)
        b2 = b2_ref[...].astype(jnp.float32)                # (1, C)
        h = jnp.dot(pooled, w1, preferred_element_type=jnp.float32) + b1
        h = jnp.maximum(h, 0.0)
        att2 = jnp.dot(h, w2, preferred_element_type=jnp.float32) + b2   # (2, C)
        att = att2[0:1, :] + att2[1:2, :]                   # channel_att_sum (1, C)
        scale = jax.nn.sigmoid(att) + mcin_ref[0].astype(jnp.float32)
        scale_ref[0] = scale.astype(scale_ref.dtype)


# ---------------------------------------------------------------------------
# Pass 2: y = x * scale (broadcast over spatial axis); also emit the broadcast
# scale in x.dtype (module returns it).
# ---------------------------------------------------------------------------
def _apply_kernel(x_ref, scale_ref, y_ref, sfull_ref):
    sc = scale_ref[...].astype(x_ref.dtype)[:, :, None]     # (N, C, 1)
    x = x_ref[...]
    y_ref[...] = (x * sc).astype(y_ref.dtype)               # broadcast in multiply
    sfull_ref[...] = jnp.broadcast_to(sc, sfull_ref.shape).astype(sfull_ref.dtype)


def channel_gate_in(x, mcin, w1, b1, w2, b2):
    """x: (N, C, T, H, W), mcin: (N, C). Returns (x*scale, scale), both 5-D."""
    N, C, T, H, W = x.shape
    S = T * H * W
    Ch = w1.shape[1]
    itemsize = jnp.dtype(x.dtype).itemsize

    xf = x.reshape(N, C, S)
    b1r = b1.reshape(1, Ch)
    b2r = b2.reshape(1, C)
    mcin3 = mcin.reshape(N, 1, C)

    # --- spatial tile selection (shared by both passes) ---------------------
    # Apply pass is the tightest: 3 blocks (x, y, sfull), double-buffered.
    budget = 20 * 1024 * 1024
    bytes_per_lane = 6 * N * C * itemsize
    cap_lanes = max(128, (budget // max(bytes_per_lane, 1)) // 128 * 128)
    s128 = _round_up(S, 128)
    num_s = -(-s128 // cap_lanes)                 # number of spatial tiles
    ts = _round_up(-(-s128 // num_s), 128)        # lane-dense tile, <= cap_lanes
    s_pad = ts * num_s
    padded = s_pad != S
    if padded:
        xf = jnp.pad(xf, ((0, 0), (0, 0), (0, s_pad - S)))

    vmem_limit = 32 * 1024 * 1024

    # --- pass 1: per-(N, C) gate scale --------------------------------------
    gate_kernel = functools.partial(_gate_kernel, s_total=S, tile_s=ts,
                                    masked=padded)
    scale3 = pl.pallas_call(
        gate_kernel,
        out_shape=jax.ShapeDtypeStruct((N, 1, C), jnp.float32),
        grid=(N, num_s),
        in_specs=[
            pl.BlockSpec((1, C, ts), lambda n, s: (n, 0, s)),
            pl.BlockSpec((C, Ch), lambda n, s: (0, 0)),
            pl.BlockSpec((1, Ch), lambda n, s: (0, 0)),
            pl.BlockSpec((Ch, C), lambda n, s: (0, 0)),
            pl.BlockSpec((1, C), lambda n, s: (0, 0)),
            pl.BlockSpec((1, 1, C), lambda n, s: (n, 0, 0)),
        ],
        out_specs=pl.BlockSpec((1, 1, C), lambda n, s: (n, 0, 0)),
        scratch_shapes=[pltpu.VMEM((1, C), jnp.float32),
                        pltpu.VMEM((1, C), jnp.float32)],
        compiler_params=pltpu.CompilerParams(
            dimension_semantics=("parallel", "arbitrary"),
            vmem_limit_bytes=vmem_limit),
    )(xf, w1, b1r, w2, b2r, mcin3)
    scale2d = scale3.reshape(N, C)

    # --- pass 2: elementwise scale, large lane-dense tiles -------------------
    y_f, sfull_f = pl.pallas_call(
        _apply_kernel,
        out_shape=(
            jax.ShapeDtypeStruct((N, C, s_pad), x.dtype),
            jax.ShapeDtypeStruct((N, C, s_pad), x.dtype),
        ),
        grid=(num_s,),
        in_specs=[
            pl.BlockSpec((N, C, ts), lambda s: (0, 0, s)),
            pl.BlockSpec((N, C), lambda s: (0, 0)),
        ],
        out_specs=(
            pl.BlockSpec((N, C, ts), lambda s: (0, 0, s)),
            pl.BlockSpec((N, C, ts), lambda s: (0, 0, s)),
        ),
        compiler_params=pltpu.CompilerParams(
            dimension_semantics=("parallel",),
            vmem_limit_bytes=vmem_limit),
    )(xf, scale2d)

    if padded:
        y_f = y_f[:, :, :S]
        sfull_f = sfull_f[:, :, :S]
    return y_f.reshape(N, C, T, H, W), sfull_f.reshape(N, C, T, H, W)


def _reference(x, mcin, w1, b1, w2, b2):
    """Pure-JAX reference matching the PyTorch forward (pool_types=['avg','max'])."""
    N, C = x.shape[0], x.shape[1]
    xf = x.reshape(N, C, -1).astype(jnp.float32)
    avg = jnp.mean(xf, axis=-1)
    mx = jnp.max(xf, axis=-1)

    def mlp(p):
        h = jnp.maximum(p @ w1 + b1, 0.0)
        return h @ w2 + b2

    att = mlp(avg) + mlp(mx)
    scale = jax.nn.sigmoid(att) + mcin
    scale5 = scale[:, :, None, None, None] * jnp.ones_like(x)
    return x * scale5, scale5


def _run_case(key, N, C, T, H, W, reduction_ratio):
    Ch = C // reduction_ratio
    kx, km, kw1, kb1, kw2, kb2 = jax.random.split(key, 6)

    x = jax.random.normal(kx, (N, C, T, H, W), dtype=jnp.float32)
    mcin = jax.random.normal(km, (N, C), dtype=jnp.float32)

    bound1 = 1.0 / (C ** 0.5)
    bound2 = 1.0 / (Ch ** 0.5)
    w1 = jax.random.uniform(kw1, (C, Ch), jnp.float32, -bound1, bound1)
    b1 = jax.random.uniform(kb1, (Ch,), jnp.float32, -bound1, bound1)
    w2 = jax.random.uniform(kw2, (Ch, C), jnp.float32, -bound2, bound2)
    b2 = jax.random.uniform(kb2, (C,), jnp.float32, -bound2, bound2)

    y, scale = channel_gate_in(x, mcin, w1, b1, w2, b2)
    jax.block_until_ready((y, scale))

    y_ref, scale_ref = _reference(x, mcin, w1, b1, w2, b2)
    assert jnp.allclose(y, y_ref, atol=1e-5, rtol=1e-5), "output mismatch"
    assert jnp.allclose(scale, scale_ref, atol=1e-5, rtol=1e-5), "scale mismatch"


if __name__ == "__main__":
    key = jax.random.PRNGKey(0)
    k1, k2 = jax.random.split(key)
    # 128-multiple spatial size (no padding path).
    _run_case(k1, N=2, C=32, T=4, H=8, W=8, reduction_ratio=8)
    # Non-128-multiple spatial size (exercises padded/masked path).
    _run_case(k2, N=2, C=32, T=3, H=5, W=5, reduction_ratio=8)
    print("KERNEL_OK")
</pallas_src>

<mosaic_0001>
module attributes {stable_mosaic.version = 11 : i64} {
  func.func @_gate_kernel(%arg0: i32, %arg1: i32, %arg2: memref<1x32x256xf32, #tpu.memory_space<vmem>>, %arg3: memref<32x4xf32, #tpu.memory_space<vmem>>, %arg4: memref<1x4xf32, #tpu.memory_space<vmem>>, %arg5: memref<4x32xf32, #tpu.memory_space<vmem>>, %arg6: memref<1x32xf32, #tpu.memory_space<vmem>>, %arg7: memref<1x1x32xf32, #tpu.memory_space<vmem>>, %arg8: memref<1x1x32xf32, #tpu.memory_space<vmem>>, %arg9: memref<1x32xf32, #tpu.memory_space<vmem>>, %arg10: memref<1x32xf32, #tpu.memory_space<vmem>>) attributes {dimension_semantics = [#tpu.dimension_semantics<parallel>, #tpu.dimension_semantics<arbitrary>], iteration_bounds = array<i64: 2, 1>, scalar_prefetch = 0 : i64, scratch_operands = 2 : i64, tpu.core_type = #tpu.core_type<tc>, window_params = [{transform_indices = @transform_0, window_bounds = array<i64: 1, 32, 256>}, {pipeline_mode = #tpu.pipeline_mode<synchronous>, transform_indices = @transform_1, window_bounds = array<i64: 32, 4>}, {pipeline_mode = #tpu.pipeline_mode<synchronous>, transform_indices = @transform_2, window_bounds = array<i64: 1, 4>}, {pipeline_mode = #tpu.pipeline_mode<synchronous>, transform_indices = @transform_3, window_bounds = array<i64: 4, 32>}, {pipeline_mode = #tpu.pipeline_mode<synchronous>, transform_indices = @transform_4, window_bounds = array<i64: 1, 32>}, {transform_indices = @transform_5, window_bounds = array<i64: 1, 1, 32>}, {transform_indices = @transform_6, window_bounds = array<i64: 1, 1, 32>}]} {
    %c0_i32 = arith.constant 0 : i32
    %0 = arith.cmpi eq, %arg1, %c0_i32 : i32
    %1 = arith.extui %0 : i1 to i32
    %c0_i32_0 = arith.constant 0 : i32
    %2 = arith.cmpi ne, %1, %c0_i32_0 : i32
    scf.if %2 {
      %cst_14 = arith.constant 0.000000e+00 : f32
      %15 = vector.broadcast %cst_14 : f32 to vector<1x32xf32>
      %c0_15 = arith.constant 0 : index
      %c0_16 = arith.constant 0 : index
      %16 = vector.load %arg9[%c0_15, %c0_16] : memref<1x32xf32, #tpu.memory_space<vmem>>, vector<1x32xf32>
      tpu.vector_store %arg9[%c0_15, %c0_16], %15 {strides = array<i32>} : memref<1x32xf32, #tpu.memory_space<vmem>>, vector<1x32xf32>,
      %cst_17 = arith.constant 0xFF800000 : f32
      %17 = vector.broadcast %cst_17 : f32 to vector<1x32xf32>
      %c0_18 = arith.constant 0 : index
      %c0_19 = arith.constant 0 : index
      %18 = vector.load %arg10[%c0_18, %c0_19] : memref<1x32xf32, #tpu.memory_space<vmem>>, vector<1x32xf32>
      tpu.vector_store %arg10[%c0_18, %c0_19], %17 {strides = array<i32>} : memref<1x32xf32, #tpu.memory_space<vmem>>, vector<1x32xf32>,
    } else {
    }
    %c0 = arith.constant 0 : index
    %c0_1 = arith.constant 0 : index
    %c0_2 = arith.constant 0 : index
    %3 = vector.load %arg2[%c0, %c0_1, %c0_2] : memref<1x32x256xf32, #tpu.memory_space<vmem>>, vector<1x32x256xf32>
    %c0_3 = arith.constant 0 : index
    %c0_4 = arith.constant 0 : index
    %4 = vector.load %arg9[%c0_3, %c0_4] : memref<1x32xf32, #tpu.memory_space<vmem>>, vector<1x32xf32>
    %cst = arith.constant dense<0.000000e+00> : vector<1x32xf32>
    %5 = vector.multi_reduction <add>, %3, %cst [2] : vector<1x32x256xf32> to vector<1x32xf32>
    %6 = arith.addf %4, %5 : vector<1x32xf32>
    %c0_5 = arith.constant 0 : index
    %c0_6 = arith.constant 0 : index
    %7 = vector.load %arg9[%c0_5, %c0_6] : memref<1x32xf32, #tpu.memory_space<vmem>>, vector<1x32xf32>
    tpu.vector_store %arg9[%c0_5, %c0_6], %6 {strides = array<i32>} : memref<1x32xf32, #tpu.memory_space<vmem>>, vector<1x32xf32>,
    %c0_7 = arith.constant 0 : index
    %c0_8 = arith.constant 0 : index
    %8 = vector.load %arg10[%c0_7, %c0_8] : memref<1x32xf32, #tpu.memory_space<vmem>>, vector<1x32xf32>
    %cst_9 = arith.constant dense<0xFF800000> : vector<1x32xf32>
    %9 = vector.multi_reduction <maximumf>, %3, %cst_9 [2] : vector<1x32x256xf32> to vector<1x32xf32>
    %10 = arith.maximumf %8, %9 : vector<1x32xf32>
    %c0_10 = arith.constant 0 : index
    %c0_11 = arith.constant 0 : index
    %11 = vector.load %arg10[%c0_10, %c0_11] : memref<1x32xf32, #tpu.memory_space<vmem>>, vector<1x32xf32>
    tpu.vector_store %arg10[%c0_10, %c0_11], %10 {strides = array<i32>} : memref<1x32xf32, #tpu.memory_space<vmem>>, vector<1x32xf32>,
    %c0_i32_12 = arith.constant 0 : i32
    %12 = arith.cmpi eq, %arg1, %c0_i32_12 : i32
    %13 = arith.extui %12 : i1 to i32
    %c0_i32_13 = arith.constant 0 : i32
    %14 = arith.cmpi ne, %13, %c0_i32_13 : i32
    scf.if %14 {
      %c0_14 = arith.constant 0 : index
      %c0_15 = arith.constant 0 : index
      %15 = vector.load %arg9[%c0_14, %c0_15] : memref<1x32xf32, #tpu.memory_space<vmem>>, vector<1x32xf32>
      %cst_16 = arith.constant 3.906250e-03 : f32
      %16 = vector.broadcast %cst_16 : f32 to vector<1x32xf32>
      %17 = arith.mulf %15, %16 : vector<1x32xf32>
      %c0_17 = arith.constant 0 : index
      %c0_18 = arith.constant 0 : index
      %18 = vector.load %arg10[%c0_17, %c0_18] : memref<1x32xf32, #tpu.memory_space<vmem>>, vector<1x32xf32>
      %19 = tpu.concatenate %17, %18 in 0 : vector<1x32xf32>, vector<1x32xf32> -> vector<2x32xf32>
      %c0_19 = arith.constant 0 : index
      %c0_20 = arith.constant 0 : index
      %20 = vector.load %arg3[%c0_19, %c0_20] : memref<32x4xf32, #tpu.memory_space<vmem>>, vector<32x4xf32>
      %c0_21 = arith.constant 0 : index
      %c0_22 = arith.constant 0 : index
      %21 = vector.load %arg4[%c0_21, %c0_22] : memref<1x4xf32, #tpu.memory_space<vmem>>, vector<1x4xf32>
      %c0_23 = arith.constant 0 : index
      %c0_24 = arith.constant 0 : index
      %22 = vector.load %arg5[%c0_23, %c0_24] : memref<4x32xf32, #tpu.memory_space<vmem>>, vector<4x32xf32>
      %c0_25 = arith.constant 0 : index
      %c0_26 = arith.constant 0 : index
      %23 = vector.load %arg6[%c0_25, %c0_26] : memref<1x32xf32, #tpu.memory_space<vmem>>, vector<1x32xf32>
      %cst_27 = arith.constant dense<0.000000e+00> : vector<2x4xf32>
      %24 = tpu.matmul %19, %20, %cst_27 {dimension_numbers = #tpu.dot_dimension_numbers<[1], [0], [0], [1], [0, 0, 1, 1], [], []>} : vector<2x32xf32>, vector<32x4xf32>, vector<2x4xf32> -> vector<2x4xf32>
      %25 = vector.broadcast %21 : vector<1x4xf32> to vector<2x4xf32>
      %26 = arith.addf %24, %25 : vector<2x4xf32>
      %cst_28 = arith.constant 0.000000e+00 : f32
      %27 = vector.broadcast %cst_28 : f32 to vector<2x4xf32>
      %28 = arith.maximumf %26, %27 : vector<2x4xf32>
      %cst_29 = arith.constant dense<0.000000e+00> : vector<2x32xf32>
      %29 = tpu.matmul %28, %22, %cst_29 {dimension_numbers = #tpu.dot_dimension_numbers<[1], [0], [0], [1], [0, 0, 1, 1], [], []>} : vector<2x4xf32>, vector<4x32xf32>, vector<2x32xf32> -> vector<2x32xf32>
      %30 = vector.broadcast %23 : vector<1x32xf32> to vector<2x32xf32>
      %31 = arith.addf %29, %30 : vector<2x32xf32>
      %32 = vector.extract_strided_slice %31 {offsets = [0, 0], sizes = [1, 32], strides = [1, 1]} : vector<2x32xf32> to vector<1x32xf32>
      %33 = vector.extract_strided_slice %31 {offsets = [1, 0], sizes = [1, 32], strides = [1, 1]} : vector<2x32xf32> to vector<1x32xf32>
      %34 = arith.addf %32, %33 : vector<1x32xf32>
      %35 = arith.negf %34 : vector<1x32xf32>
      %36 = math.exp %35 : vector<1x32xf32>
      %cst_30 = arith.constant 1.000000e+00 : f32
      %37 = vector.broadcast %cst_30 : f32 to vector<1x32xf32>
      %38 = arith.addf %37, %36 : vector<1x32xf32>
      %39 = arith.divf %37, %38 : vector<1x32xf32>
      %c0_31 = arith.constant 0 : index
      %c0_32 = arith.constant 0 : index
      %c0_33 = arith.constant 0 : index
      %40 = vector.load %arg7[%c0_31, %c0_32, %c0_33] : memref<1x1x32xf32, #tpu.memory_space<vmem>>, vector<1x1x32xf32>
      %41 = vector.shape_cast %40 : vector<1x1x32xf32> to vector<1x32xf32>
      %42 = arith.addf %39, %41 : vector<1x32xf32>
      %c0_34 = arith.constant 0 : index
      %c0_35 = arith.constant 0 : index
      %c0_36 = arith.constant 0 : index
      %43 = vector.load %arg8[%c0_34, %c0_35, %c0_36] : memref<1x1x32xf32, #tpu.memory_space<vmem>>, vector<1x1x32xf32>
      %44 = vector.shape_cast %43 : vector<1x1x32xf32> to vector<1x32xf32>
      %45 = vector.shape_cast %42 : vector<1x32xf32> to vector<1x1x32xf32>
      tpu.vector_store %arg8[%c0_34, %c0_35, %c0_36], %45 {strides = array<i32>} : memref<1x1x32xf32, #tpu.memory_space<vmem>>, vector<1x1x32xf32>,
    } else {
    }
    return
  }
  func.func @transform_0(%arg0: i32, %arg1: i32) -> (i32, i32, i32) {
    %c0_i32 = arith.constant 0 : i32
    %c0_i32_0 = arith.constant 0 : i32
    return %arg0, %c0_i32, %arg1 : i32, i32, i32
  }
  func.func @transform_1(%arg0: i32, %arg1: i32) -> (i32, i32) {
    %c0_i32 = arith.constant 0 : i32
    %c0_i32_0 = arith.constant 0 : i32
    %c0_i32_1 = arith.constant 0 : i32
    return %c0_i32, %c0_i32_0 : i32, i32
  }
  func.func @transform_2(%arg0: i32, %arg1: i32) -> (i32, i32) {
    %c0_i32 = arith.constant 0 : i32
    %c0_i32_0 = arith.constant 0 : i32
    %c0_i32_1 = arith.constant 0 : i32
    return %c0_i32, %c0_i32_0 : i32, i32
  }
  func.func @transform_3(%arg0: i32, %arg1: i32) -> (i32, i32) {
    %c0_i32 = arith.constant 0 : i32
    %c0_i32_0 = arith.constant 0 : i32
    %c0_i32_1 = arith.constant 0 : i32
    return %c0_i32, %c0_i32_0 : i32, i32
  }
  func.func @transform_4(%arg0: i32, %arg1: i32) -> (i32, i32) {
    %c0_i32 = arith.constant 0 : i32
    %c0_i32_0 = arith.constant 0 : i32
    %c0_i32_1 = arith.constant 0 : i32
    return %c0_i32, %c0_i32_0 : i32, i32
  }
  func.func @transform_5(%arg0: i32, %arg1: i32) -> (i32, i32, i32) {
    %c0_i32 = arith.constant 0 : i32
    %c0_i32_0 = arith.constant 0 : i32
    %c0_i32_1 = arith.constant 0 : i32
    return %arg0, %c0_i32, %c0_i32_0 : i32, i32, i32
  }
  func.func @transform_6(%arg0: i32, %arg1: i32) -> (i32, i32, i32) {
    %c0_i32 = arith.constant 0 : i32
    %c0_i32_0 = arith.constant 0 : i32
    %c0_i32_1 = arith.constant 0 : i32
    return %arg0, %c0_i32, %c0_i32_0 : i32, i32, i32
  }
}

</mosaic_0001>

<bundles_post_ra>
// kernel: tpu_custom_call.1
= control target key start
LH: loop header
LB: loop body
LE: loop exit
PB: predicated region body
PF: predicated region fallthrough
CT: control target
= control target key end

     0   :  { %11 = vsyncpa [#allocation5], 0  ;;  %s2046_s0 = inlined_call_operand.hbm [shape: f32[2,32,256], index: 0, kind: input, shape index: {}]   ;;  %s2047_s1 = inlined_call_operand.vmem [shape: f32[32,4], index: 1, kind: input, shape index: {}]   ;;  %s2048_s2 = inlined_call_operand.vmem [shape: f32[1,4], index: 2, kind: input, shape index: {}]   ;;  %s2049_s3 = inlined_call_operand.vmem [shape: f32[4,32], index: 3, kind: input, shape index: {}]   ;;  %s2050_s4 = inlined_call_operand.vmem [shape: f32[1,32], index: 4, kind: input, shape index: {}]   ;;  %s2051_s5 = inlined_call_operand.vmem [shape: f32[2,1,32], index: 5, kind: input, shape index: {}]   ;;  %s2052_s6 = inlined_call_operand.hbm [shape: f32[2,1,32], index: 6, kind: output, shape index: {}]  }
   0x1   :  { %13 = vsyncpa [#allocation5 + $0x1], 0 }
   0x2   :  { %14 = vsyncpa [#allocation6], 0 }
   0x3   :  { %16 = vsyncpa [#allocation6 + $0x1], 0  ;;  %s1684_s21 = smov 0   ;;  %s1686_s22 = smov 0  }
   0x4   :  { %s1688_s23 = smov 0   ;;  %s1690_s24 = smov 0  }
   0x5   :  { %s1692_s25 = smov 0   ;;  %s1694_s26 = smov 0  }
   0x6 LB: > { %s1400_s27 = sadd.s32 4294967295, %s1637_s26   ;;  %s1401_s28 = sadd.s32 4294967294, %s1637_s26   ;;  %s1637_s26 = sphi %s1694_s26, %s22_s26   ;;  %s1633_s25 = sphi %s1692_s25, %s2067_s25   ;;  %s1629_s24 = sphi %s1690_s24, %s2066_s24   ;;  %s1625_s23 = sphi %s1688_s23, %s2065_s23   ;;  %s1621_s22 = sphi %s1686_s22, %s2064_s22   ;;  %s1617_s21 = sphi %s1684_s21, %s2063_s21  }
   0x7   : > { %s34_s29 = sadd.s32 1, %s1633_s25  ;;  %s43_s30 = sadd.s32 1, %s1625_s23 }
   0x8   : > { %p36_p0 = scmp.ge.s32.totalorder %s34_s29, 2  ;;  %p50_p1 = scmp.ne.s32.totalorder %s1625_s23, %s1621_s22 }
   0x9   : > { %p51_p2 = scmp.eq.s32.totalorder %s1637_s26, 0  ;;  %p56_p3 = scmp.ne.s32.totalorder %s1621_s22, %s1617_s21 }
   0xa   : > { %s2069_s29 = smov (%p36_p0, %s34_s29), 0  ;;  %p57_p5 = scmp.eq.s32.totalorder %s1400_s27, 0 }
   0xb   : > { %p1725_p4 = por %p51_p2, %p50_p1  ;;  %s38_s8 = ssub.s32 %s1633_s25, %s2069_s29 }
   0xc   : > { %p190_p6 = scmp.eq.s32.totalorder %s1400_s27, 1  ;;  %p41_p7 = scmp.eq.s32.totalorder %s38_s8, 0 }
   0xd   : > { %p1731_p8 = por %p57_p5, %p56_p3  ;;  %p196_p10 = scmp.eq.s32.totalorder %s1401_s28, 1 }
   0xe   : > { %p1735_p9 = por %p190_p6, %p50_p1  ;;  %p1461_p13 = scmp.lt.s32.totalorder %s1637_s26, 2 }
   0xf   : > { %s1740_s11 = scalar_select %p41_p7, %s1625_s23, %s43_s30  }
  0x10   : > { %s2056_s10 = scalar_select %p1735_p9, 1, 0 }
  0x11   : > { %p1742_p11 = por %p196_p10, %p56_p3  ;;  %s228_s13 = sand.u32 1, %s1625_s23  }
  0x12   : > { %s1404_s14 = sshll.u32 %s228_s13, 6  ;;  %s1419_s15 = sshll.u32 %s1633_s25, 10 }
  0x13   : > { %s2057_s12 = scalar_select %p1742_p11, 1, 0 }
  0x14   : > { %s1753_s18 = scalar_lea.hbm %s2046_s0, %s1419_s15  ;;  %s232_s19 = scalar_lea.vmem [#allocation4], %s1404_s14 }
  0x15   : > { %s241_s20 = sshll.u32 %s232_s19, 4  ;;  %p1759_p0 = pnand %p1461_p13, %p1725_p4  ;;  %s1755_s20 = int_to_ptr.vmem [resolvable:$true] %s241_s20 }
  0x16   : > { %s1764_s28 = scalar_lea.sflag [#allocation5], %s228_s13  ;;  %s1525_s30 = scalar_lea.hbm %s1753_s18, 1024 }
  0x17   : > { %p1526_p2 = scmp.ne.s32.totalorder %s1753_s18, %s1525_s30  ;;  %p1527_p3 = pneg %p1759_p0 }
  0x18   : > { %s1530_s7 = scalar_lea.hbm %s2046_s0, 2048  ;;  %p1531_p4 = scmp.lt.u32.totalorder %s1753_s18, %s2046_s0 }
  0x19   : > { %p1528_p5 = pnand %p1527_p3, %p1526_p2  ;;  %p1532_p7 = scmp.lt.u32.totalorder %s1530_s7, %s1525_s30 }
  0x1a   : > { %p1534_p13 = scmp.lt.u32.totalorder %s1525_s30, %s1753_s18 }
  0x1b   : > { %p1529_p6 = pneg %p1528_p5  ;;  %p1533_p10 = por %p1532_p7, %p1531_p4 }
  0x1d   : > { %p1535_p12 = por %p1534_p13, %p1533_p10 }
  0x1f   : > { %p1536_p1 = pnand %p1535_p12, %p1529_p6 }
  0x21   : > { %1539 = shalt.err (!%p1536_p1)
}
  0x22   : > { %s1540_s13 = scalar_lea.vmem %s1755_s20, 1024  ;;  %s1639_s17 = smov [#allocation4]  }
  0x23   : > { %p1541_p2 = scmp.ne.s32.totalorder %s1755_s20, %s1540_s13  ;;  %s1545_s19 = sshll.u32 %s1639_s17, 4  ;;  %s1546_s19 = int_to_ptr.vmem [resolvable:$false] %s1545_s19 }
  0x24   : > { %s1547_s8 = scalar_lea.vmem %s1546_s19, 2048  ;;  %p1548_p9 = scmp.lt.s32.totalorder %s1755_s20, %s1546_s19 }
  0x25   : > { %p1543_p5 = pnand %p1541_p2, %p1527_p3  ;;  %p1549_p4 = scmp.lt.s32.totalorder %s1547_s8, %s1540_s13 }
  0x27   : > { %p1544_p11 = pneg %p1543_p5  ;;  %p1550_p7 = por %p1549_p4, %p1548_p9 }
  0x29   : > { %p1551_p10 = pnand %p1550_p7, %p1544_p11 }
  0x2b   : > { %1554 = shalt.err (!%p1551_p10)
}
  0x2c   : > { %s1640_s30 = smov 256   ;;  %s1641_s14 = smov 16  }
  0x2d   : > { %1456 = dma.hbm_to_vmem [thread:$0]  (!%p1759_p0), %s1753_s18, 1024, %s1755_s20, %s1764_s28, %s1640_s30, %s1640_s30, %s1641_s14  }
  0x2e   : > { %p255_p12 = scmp.lt.s32.totalorder %s1637_s26, 3  ;;  %p2059_p1 = scmp.ge.s32.totalorder %s1637_s26, 1 }
  0x30   : > { %p256_p3 = pnand %p2059_p1, %p255_p12 }
  0x31   : > { %s1796_s7 = sand.u32 (!%p256_p3), 1, %s1621_s22  }
  0x32   : > { %259 = sbr.rel (%p256_p3) target bundleno = 874 (0x36a), region = 44  ;;  %s1408_s15 = sshll.u32 (!%p256_p3), %s1796_s7, 6 }
  0x33   : > { %s262_s16 = scalar_lea.sflag (!%p256_p3), [#allocation5], %s1796_s7  ;;  %s265_s13 = scalar_lea.vmem (!%p256_p3), [#allocation4], %s1408_s15 }
  0x39   : > { %1608 = dma.done.wait (%p1731_p8), %s262_s16, 1024  }
  0x3a   : > { %1610 = vsyncadd (%p1731_p8), %s262_s16, 4294966272  ;;  %v307_v0 = vld [vmem:[%s265_s13] sm:$0xff]  ;;  %v308_v1 = vld [vmem:[%s265_s13 + $0x8] sm:$0xff]  ;;  %v1642_v16 = vmov 0   ;;  %v332_v17 = vlaneseq  ;;  %v1643_v18 = vmov 1966171168  }
  0x3b   : > { %v309_v2 = vld [vmem:[%s265_s13 + $0x10] sm:$0xff]  ;;  %v316_v3 = vadd.f32 %v308_v1, %v307_v0  ;;  %v310_v4 = vld [vmem:[%s265_s13 + $0x18] sm:$0xff]  ;;  %v311_v5 = vld [vmem:[%s265_s13 + $0x20] sm:$0xff]  ;;  %v714_v12 = vmax.f32 %v307_v0, %v308_v1  ;;  %1519 = vset.pattern.permute.xlu0 %v1642_v16  ;;  %1520 = vset.pattern.permute.xlu1 %v1642_v16  ;;  %v465_v19 = vunpack.c.l.s4 %v1643_v18  ;;  %vm304_vm0 = vcmask 253952   ;;  %p297_p8 = scmp.lt.s32.totalorder %s1629_s24, 1  ;;  %s1416_s17 = sshll.u32 %s1629_s24, 4 }
  0x3c   : > { %v312_v6 = vld [vmem:[%s265_s13 + $0x28] sm:$0xff]  ;;  %v313_v8 = vld [vmem:[%s265_s13 + $0x30] sm:$0xff]  ;;  %v314_v9 = vld [vmem:[%s265_s13 + $0x38] sm:$0xff]  ;;  %v319_v10 = vadd.f32 %v310_v4, %v309_v2  ;;  %v717_v13 = vmax.f32 %v309_v2, %v310_v4  ;;  %v1805_v20 = vshrl.u32 %v332_v17, 7  ;;  %vm1647_vm1 = vmmov 0   ;;  %s295_s19 = scalar_lea.vmem [#allocation7], %s1796_s7  ;;  %s1996_s15 = scalar_lea.hbm %s2052_s6, %s1416_s17 }
  0x3d   : > { %v322_v7 = vadd.f32 %v312_v6, %v311_v5  ;;  %317 = vadd.xlane.f32.xlu0 %v316_v3  ;;  %v325_v11 = vadd.f32 %v314_v9, %v313_v8  ;;  %v720_v14 = vmax.f32 %v311_v5, %v312_v6  ;;  %v723_v15 = vmax.f32 %v313_v8, %v314_v9  ;;  %s298_s18 = scalar_select %p297_p8, %s1629_s24, 1 }
  0x3e   : > { %v466_v21 = vunpack.c.0.s8 %v465_v19  ;;  %v1808_v22 = vsub.s32 0, %v1805_v20  ;;  %v1811_v23 = vsub.s32 1, %v1805_v20  ;;  %v1814_v24 = vsub.s32 2, %v1805_v20  ;;  %s1314_s8 = sshll.u32 %s295_s19, 4  ;;  %s1302_s16 = scalar_lea.sflag [#allocation6], %s1796_s7  ;;  %s1998_s8 = int_to_ptr.vmem [resolvable:$true] %s1314_s8 }
  0x3f   : > { %323 = vadd.xlane.f32.xlu1 %v322_v7  ;;  %v1817_v25 = vsub.s32 3, %v1805_v20  ;;  %v1820_v26 = vsub.s32 4, %v1805_v20  ;;  %v1823_v27 = vsub.s32 5, %v1805_v20  ;;  %v1826_v28 = vsub.s32 6, %v1805_v20  ;;  %s299_s28 = scalar_lea.vmem %s2051_s5, %s298_s18  ;;  %s1555_s13 = scalar_lea.vmem %s1998_s8, 16 }
  0x40   : > { %v1829_v29 = vsub.s32 7, %v1805_v20  ;;  %v1832_v31 = vsub.s32 %v466_v21, %v1805_v20  ;;  %vm679_vm2 = vcmask 130112   ;;  %vm686_vm3 = vcmask 195712   ;;  %p1556_p9 = scmp.ne.s32.totalorder %s1998_s8, %s1555_s13  ;;  %p2060_p11 = scmp.ne.s32.totalorder %s2056_s10, 0 }
  0x41   : > { %320 = vadd.xlane.f32.xlu0 %v319_v10  ;;  %vm693_vm4 = vcmask 261312   ;;  %vm1114_vm5 = vcmask 1040384   ;;  %vm1129_vm6 = vcmask 261120   ;;  %vm1214_vm7 = vcmask 1043456   ;;  %s1648_s24 = smov [#allocation7]  }
  0x42   : > { %vm1210_vm8 = vcmask 31744   ;;  %p1557_p0 = pnand %p1556_p9, %p2060_p11  ;;  %s1559_s9 = sshll.u32 %s1648_s24, 4  ;;  %s1560_s9 = int_to_ptr.vmem [resolvable:$false] %s1559_s9 }
  0x43   : > { %326 = vadd.xlane.f32.xlu1 %v325_v11  ;;  %s1561_s18 = scalar_lea.vmem %s1560_s9, 32  ;;  %p1562_p13 = scmp.lt.s32.totalorder %s1998_s8, %s1560_s9 }
  0x44   : > { %p1558_p6 = pneg %p1557_p0  ;;  %p1563_p2 = scmp.lt.s32.totalorder %s1561_s18, %s1555_s13 }
  0x45   : > { %715 = vmax.xlane.f32.xlu0 %v714_v12 }
  0x46   : > { %p1564_p5 = por %p1563_p2, %p1562_p13 }
  0x47   : > { %718 = vmax.xlane.f32.xlu1 %v717_v13 }
  0x48   : > { %p1565_p4 = pnand %p1564_p5, %p1558_p6 }
  0x49   : > { %721 = vmax.xlane.f32.xlu0 %v720_v14 }
  0x4b   : > { %724 = vmax.xlane.f32.xlu1 %v723_v15 }
  0xca   : > { %v318_v30 = vpop.xlane.xlu0 %317 }
  0xcb   : > { %v335_v33 = vrot.slane %v318_v30, %v1808_v22  ;;  %v339_v34 = vrot.slane %v318_v30, %v1811_v23  ;;  %v343_v35 = vrot.slane %v318_v30, %v1814_v24  ;;  %v347_v36 = vrot.slane %v318_v30, %v1817_v25 }
  0xcc   : > { %v324_v32 = vpop.xlane.xlu1 %323  ;;  %v351_v37 = vrot.slane %v318_v30, %v1820_v26  ;;  %v355_v38 = vrot.slane %v318_v30, %v1823_v27  ;;  %v359_v39 = vrot.slane %v318_v30, %v1826_v28  ;;  %v363_v40 = vrot.slane %v318_v30, %v1829_v29 }
  0xcd   : > { %v460_v41 = vcombine.low %v335_v33, %v339_v34  ;;  %v461_v42 = vcombine.low %v343_v35, %v347_v36  ;;  %v399_v43 = vrot.slane %v324_v32, %v1808_v22  ;;  %v403_v44 = vrot.slane %v324_v32, %v1811_v23 }
  0xce   : > { %v321_v45 = vpop.xlane.xlu0 %320  ;;  %v462_v46 = vcombine.low %v351_v37, %v355_v38  ;;  %v463_v47 = vcombine.low %v359_v39, %v363_v40  ;;  %v407_v48 = vrot.slane %v324_v32, %v1814_v24  ;;  %v411_v49 = vrot.slane %v324_v32, %v1817_v25 }
  0xcf   : > { %v470_v50 = vrot.slane %v460_v41, %v1832_v31  ;;  %v477_v51 = vrot.slane %v461_v42, %v1832_v31  ;;  %v367_v52 = vrot.slane %v321_v45, %v1808_v22  ;;  %v371_v53 = vrot.slane %v321_v45, %v1811_v23 }
  0xd0   : > { %v484_v54 = vrot.slane %v462_v46, %v1832_v31  ;;  %v491_v55 = vrot.slane %v463_v47, %v1832_v31  ;;  %v375_v56 = vrot.slane %v321_v45, %v1814_v24  ;;  %v379_v57 = vrot.slane %v321_v45, %v1817_v25  ;;  %v327_v6 = vpop.xlane.xlu1 %326 }
  0xd1   : > { %v492_v58 = vcombine.low %v470_v50, %v477_v51  ;;  %v383_v59 = vrot.slane %v321_v45, %v1820_v26  ;;  %v387_v60 = vrot.slane %v321_v45, %v1823_v27  ;;  %v391_v61 = vrot.slane %v321_v45, %v1826_v28 }
  0xd2   : > { %v493_v62 = vcombine.low %v484_v54, %v491_v55  ;;  %v395_v63 = vrot.slane %v321_v45, %v1829_v29  ;;  %v509_v0 = vcombine.low %v367_v52, %v371_v53  ;;  %v510_v1 = vcombine.low %v375_v56, %v379_v57  ;;  %v716_v42 = vpop.xlane.xlu0 %715 }
  0xd3   : > { %v500_v2 = vrot.slane %v492_v58, %v1832_v31  ;;  %v511_v3 = vcombine.low %v383_v59, %v387_v60  ;;  %v415_v4 = vrot.slane %v324_v32, %v1820_v26  ;;  %v419_v5 = vrot.slane %v324_v32, %v1823_v27 }
  0xd4   : > { %v507_v7 = vrot.slane %v493_v62, %v1832_v31  ;;  %v512_v8 = vcombine.low %v391_v61, %v395_v63  ;;  %v519_v9 = vrot.slane %v509_v0, %v1832_v31  ;;  %v526_v10 = vrot.slane %v510_v1, %v1832_v31  ;;  %v719_v59 = vpop.xlane.xlu1 %718 }
  0xd5   : > { %v533_v11 = vrot.slane %v511_v3, %v1832_v31  ;;  %v423_v12 = vrot.slane %v324_v32, %v1826_v28  ;;  %v427_v13 = vrot.slane %v324_v32, %v1829_v29  ;;  %v558_v14 = vcombine.low %v399_v43, %v403_v44 }
  0xd6   : > { %v508_v15 = vcombine.low %v500_v2, %v507_v7  ;;  %v540_v16 = vrot.slane %v512_v8, %v1832_v31  ;;  %v541_v18 = vcombine.low %v519_v9, %v526_v10  ;;  %v559_v19 = vcombine.low %v407_v48, %v411_v49 }
  0xd7   : > { %v560_v21 = vcombine.low %v415_v4, %v419_v5  ;;  %v561_v30 = vcombine.low %v423_v12, %v427_v13  ;;  %v568_v33 = vrot.slane %v558_v14, %v1832_v31  ;;  %v431_v34 = vrot.slane %v327_v6, %v1808_v22 }
  0xd8   : > { %657 = vperm.xlu0 %1519, %v508_v15   ;;  %v542_v35 = vcombine.low %v533_v11, %v540_v16  ;;  %v549_v36 = vrot.slane %v541_v18, %v1832_v31  ;;  %v575_v37 = vrot.slane %v559_v19, %v1832_v31  ;;  %v435_v32 = vrot.slane %v327_v6, %v1811_v23 }
  0xd9   : > { %v582_v38 = vrot.slane %v560_v21, %v1832_v31  ;;  %v589_v39 = vrot.slane %v561_v30, %v1832_v31  ;;  %v439_v40 = vrot.slane %v327_v6, %v1814_v24  ;;  %v443_v41 = vrot.slane %v327_v6, %v1817_v25  ;;  %v722_v30 = vpop.xlane.xlu0 %721 }
  0xda   : > { %v556_v43 = vrot.slane %v542_v35, %v1832_v31  ;;  %v590_v44 = vcombine.low %v568_v33, %v575_v37  ;;  %v447_v45 = vrot.slane %v327_v6, %v1820_v26  ;;  %v451_v46 = vrot.slane %v327_v6, %v1823_v27 }
  0xdb   : > { %v591_v47 = vcombine.low %v582_v38, %v589_v39  ;;  %v455_v48 = vrot.slane %v327_v6, %v1826_v28  ;;  %v459_v49 = vrot.slane %v327_v6, %v1829_v29  ;;  %v607_v50 = vcombine.low %v431_v34, %v435_v32 }
  0xdc   : > { %v557_v51 = vcombine.low %v549_v36, %v556_v43  ;;  %v598_v52 = vrot.slane %v590_v44, %v1832_v31  ;;  %v608_v53 = vcombine.low %v439_v40, %v443_v41  ;;  %v609_v54 = vcombine.low %v447_v45, %v451_v46 }
  0xdd   : > { %v605_v55 = vrot.slane %v591_v47, %v1832_v31  ;;  %v610_v56 = vcombine.low %v455_v48, %v459_v49  ;;  %v617_v57 = vrot.slane %v607_v50, %v1832_v31  ;;  %v733_v58 = vrot.slane %v716_v42, %v1808_v22 }
  0xde   : > { %660 = vperm.xlu1 %1520, %v557_v51   ;;  %v624_v60 = vrot.slane %v608_v53, %v1832_v31  ;;  %v631_v61 = vrot.slane %v609_v54, %v1832_v31  ;;  %v737_v62 = vrot.slane %v716_v42, %v1811_v23  ;;  %v741_v63 = vrot.slane %v716_v42, %v1814_v24 }
  0xdf   : > { %v606_v0 = vcombine.low %v598_v52, %v605_v55  ;;  %v638_v1 = vrot.slane %v610_v56, %v1832_v31  ;;  %v745_v2 = vrot.slane %v716_v42, %v1817_v25  ;;  %v749_v3 = vrot.slane %v716_v42, %v1820_v26  ;;  %v725_v52 = vpop.xlane.xlu1 %724 }
  0xe0   : > { %v639_v4 = vcombine.low %v617_v57, %v624_v60  ;;  %v753_v5 = vrot.slane %v716_v42, %v1823_v27  ;;  %v757_v6 = vrot.slane %v716_v42, %v1826_v28  ;;  %v761_v7 = vrot.slane %v716_v42, %v1829_v29 }
  0xe1   : > { %v640_v8 = vcombine.low %v631_v61, %v638_v1  ;;  %v858_v9 = vcombine.low %v733_v58, %v737_v62  ;;  %v859_v10 = vcombine.low %v741_v63, %v745_v2  ;;  %v765_v11 = vrot.slane %v719_v59, %v1808_v22 }
  0xe2   : > { %663 = vperm.xlu1 %1520, %v606_v0   ;;  %v647_v12 = vrot.slane %v639_v4, %v1832_v31  ;;  %v860_v13 = vcombine.low %v749_v3, %v753_v5  ;;  %v861_v14 = vcombine.low %v757_v6, %v761_v7  ;;  %v769_v15 = vrot.slane %v719_v59, %v1811_v23 }
  0xe3   : > { %v654_v16 = vrot.slane %v640_v8, %v1832_v31  ;;  %v868_v18 = vrot.slane %v858_v9, %v1832_v31  ;;  %v875_v19 = vrot.slane %v859_v10, %v1832_v31  ;;  %v773_v21 = vrot.slane %v719_v59, %v1814_v24 }
  0xe4   : > { %v882_v33 = vrot.slane %v860_v13, %v1832_v31  ;;  %v889_v34 = vrot.slane %v861_v14, %v1832_v31  ;;  %v777_v35 = vrot.slane %v719_v59, %v1817_v25  ;;  %v781_v36 = vrot.slane %v719_v59, %v1820_v26 }
  0xe5   : > { %v655_v37 = vcombine.low %v647_v12, %v654_v16  ;;  %v890_v32 = vcombine.low %v868_v18, %v875_v19  ;;  %v785_v38 = vrot.slane %v719_v59, %v1823_v27  ;;  %v789_v39 = vrot.slane %v719_v59, %v1826_v28 }
  0xe6   : > { %v891_v40 = vcombine.low %v882_v33, %v889_v34  ;;  %v793_v41 = vrot.slane %v719_v59, %v1829_v29  ;;  %v907_v42 = vcombine.low %v765_v11, %v769_v15  ;;  %v908_v43 = vcombine.low %v773_v21, %v777_v35 }
  0xe7   : > { %666 = vperm.xlu1 %1520, %v655_v37   ;;  %v898_v44 = vrot.slane %v890_v32, %v1832_v31  ;;  %v909_v45 = vcombine.low %v781_v36, %v785_v38  ;;  %v797_v46 = vrot.slane %v722_v30, %v1808_v22  ;;  %v801_v47 = vrot.slane %v722_v30, %v1811_v23 }
  0xe8   : > { %v905_v48 = vrot.slane %v891_v40, %v1832_v31  ;;  %v910_v49 = vcombine.low %v789_v39, %v793_v41  ;;  %v917_v50 = vrot.slane %v907_v42, %v1832_v31  ;;  %v924_v51 = vrot.slane %v908_v43, %v1832_v31  ;;  %v1116_v42 = vld [vmem:[%s2047_s1] sm:$0xff]  ;;  %v1117_v43 = vld [vmem:[%s2047_s1 + $0x8] sm:$0xff] }
  0xe9   : > { %v931_v53 = vrot.slane %v909_v45, %v1832_v31  ;;  %v805_v54 = vrot.slane %v722_v30, %v1814_v24  ;;  %v809_v55 = vrot.slane %v722_v30, %v1817_v25  ;;  %v813_v56 = vrot.slane %v722_v30, %v1820_v26  ;;  %v1118_v45 = vld [vmem:[%s2047_s1 + $0x10] sm:$0xff] }
  0xea   : > { %v906_v57 = vcombine.low %v898_v44, %v905_v48  ;;  %v938_v58 = vrot.slane %v910_v49, %v1832_v31  ;;  %v939_v59 = vcombine.low %v917_v50, %v924_v51  ;;  %v817_v60 = vrot.slane %v722_v30, %v1823_v27 }
  0xeb   : > { %v821_v61 = vrot.slane %v722_v30, %v1826_v28  ;;  %v825_v62 = vrot.slane %v722_v30, %v1829_v29  ;;  %v956_v63 = vcombine.low %v797_v46, %v801_v47  ;;  %v957_v0 = vcombine.low %v805_v54, %v809_v55  ;;  %v1119_v46 = vld [vmem:[%s2047_s1 + $0x18] sm:$0xff] }
  0xec   : > { %1055 = vperm.xlu1 %1520, %v906_v57   ;;  %v940_v1 = vcombine.low %v931_v53, %v938_v58  ;;  %v947_v2 = vrot.slane %v939_v59, %v1832_v31  ;;  %v958_v3 = vcombine.low %v813_v56, %v817_v60  ;;  %v829_v4 = vrot.slane %v725_v52, %v1808_v22 }
  0xed   : > { %v959_v5 = vcombine.low %v821_v61, %v825_v62  ;;  %v966_v6 = vrot.slane %v956_v63, %v1832_v31  ;;  %v973_v7 = vrot.slane %v957_v0, %v1832_v31  ;;  %v833_v8 = vrot.slane %v725_v52, %v1811_v23 }
  0xee   : > { %v954_v9 = vrot.slane %v940_v1, %v1832_v31  ;;  %v980_v10 = vrot.slane %v958_v3, %v1832_v31  ;;  %v837_v11 = vrot.slane %v725_v52, %v1814_v24  ;;  %v841_v12 = vrot.slane %v725_v52, %v1817_v25 }
  0xef   : > { %v987_v13 = vrot.slane %v959_v5, %v1832_v31  ;;  %v988_v14 = vcombine.low %v966_v6, %v973_v7  ;;  %v845_v22 = vrot.slane %v725_v52, %v1820_v26  ;;  %v849_v15 = vrot.slane %v725_v52, %v1823_v27 }
  0xf0   : > { %v955_v16 = vcombine.low %v947_v2, %v954_v9  ;;  %v853_v18 = vrot.slane %v725_v52, %v1826_v28  ;;  %v857_v23 = vrot.slane %v725_v52, %v1829_v29  ;;  %v1005_v19 = vcombine.low %v829_v4, %v833_v8 }
  0xf1   : > { %v989_v21 = vcombine.low %v980_v10, %v987_v13  ;;  %v996_v30 = vrot.slane %v988_v14, %v1832_v31  ;;  %v1006_v33 = vcombine.low %v837_v11, %v841_v12  ;;  %v1007_v24 = vcombine.low %v845_v22, %v849_v15 }
  0xf2   : > { %1058 = vperm.xlu1 %1520, %v955_v16   ;;  %v1008_v25 = vcombine.low %v853_v18, %v857_v23  ;;  %v1015_v34 = vrot.slane %v1005_v19, %v1832_v31  ;;  %v1644_v38 = vmov 0.0   ;;  %v1645_v41 = vmov -inf  }
  0xf3   : > { %v1003_v35 = vrot.slane %v989_v21, %v1832_v31  ;;  %v1022_v26 = vrot.slane %v1006_v33, %v1832_v31  ;;  %v1029_v27 = vrot.slane %v1007_v24, %v1832_v31  ;;  %305 = vst.msk [vmem:[#allocation2] sm:$0x1] %vm304_vm0, %v1644_v38  ;;  %1438 = vmatprep.subr.mxu1 %v1644_v38  ;;  %306 = vst.msk [vmem:[#allocation3] sm:$0x1] %vm304_vm0, %v1645_v41  ;;  %v1646_v47 = vmov 0.0|0.0  }
  0xf4   : > { %v1036_v28 = vrot.slane %v1008_v25, %v1832_v31  ;;  %v1444_v44 = vpack.c.bf16 %v1117_v43, %v1116_v42  ;;  %1443 = vmatprep.subr.bf16.mxu0 %v1646_v47  ;;  %1435 = vmatprep.mubr.msk.f32.mxu0 %vm1647_vm1, %v1644_v38  ;;  %v1447_v48 = vpack.c.bf16 %v1119_v46, %v1118_v45  ;;  %v669_v49 = vand.u32 127, %v332_v17  ;;  %v1121_v25 = vld [vmem:[%s2049_s3] sm:$0xf] }
  0xf5   : > { %v1004_v36 = vcombine.low %v996_v30, %v1003_v35  ;;  %v1037_v29 = vcombine.low %v1015_v34, %v1022_v26  ;;  %1440 = vmatprep.mubr.msk.f32.mxu1 %vm1647_vm1, %v1644_v38  ;;  %1439 = vmatpush3.msk.msra.mxu1 %vm1214_vm7, %v1121_v25  ;;  %v1298_v42 = vld [vmem:[%s299_s28] sm:$0x1] }
  0xf6   : > { %v1038_v37 = vcombine.low %v1029_v27, %v1036_v28  ;;  %1445 = vmatpush3.bf16.msra.mxu0 %v1444_v44  ;;  %v674_v50 = vadd.s32 4294967288, %v669_v49  ;;  %v681_v51 = vadd.s32 4294967280, %v669_v49  ;;  %v688_v54 = vadd.s32 4294967272, %v669_v49  ;;  %v1412_v28 = vld [vmem:[%s2050_s4] ss:$0 sm:$0xff] }
  0xf7   : > { %1061 = vperm.xlu1 %1520, %v1004_v36   ;;  %v1045_v32 = vrot.slane %v1037_v29, %v1832_v31  ;;  %1446 = vmatprep.subr.bf16.mxu0 %v1646_v47  ;;  %v672_v56 = vsub.s32 %v669_v49, %v1805_v20 }
  0xf8   : > { %v1052_v39 = vrot.slane %v1038_v37, %v1832_v31  ;;  %v677_v53 = vsub.s32 %v674_v50, %v1805_v20  ;;  %v684_v55 = vsub.s32 %v681_v51, %v1805_v20  ;;  %v691_v60 = vsub.s32 %v688_v54, %v1805_v20 }
  0xfa   : > { %v1053_v40 = vcombine.low %v1045_v32, %v1052_v39  ;;  %1448 = vmatpush3.bf16.msra.mxu0 %v1447_v48  ;;  %v315_v5 = vld [vmem:[#allocation2] sm:$0x1]  ;;  %v713_v18 = vld [vmem:[#allocation3] sm:$0x1] }
  0xfc   : > { %1064 = vperm.xlu1 %1520, %v1053_v40  }
 0x157   : > { %v658_v58 = vpop.permute.xlu0 %657 }
 0x158   : > { %v673_v62 = vrot.slane %v658_v58, %v672_v56 }
 0x15d   : > { %v661_v52 = vpop.permute.xlu1 %660 }
 0x15e   : > { %v678_v59 = vrot.slane %v661_v52, %v677_v53 }
 0x160   : > { %v680_v63 = vsel %vm679_vm2, %v678_v59, %v673_v62 }
 0x161   : > { %v664_v57 = vpop.permute.xlu1 %663 }
 0x162   : > { %v685_v61 = vrot.slane %v664_v57, %v684_v55 }
 0x164   : > { %v687_v1 = vsel %vm686_vm3, %v685_v61, %v680_v63 }
 0x166   : > { %v667_v17 = vpop.permute.xlu1 %666 }
 0x167   : > { %v692_v0 = vrot.slane %v667_v17, %v691_v60 }
 0x169   : > { %v694_v2 = vsel %vm693_vm4, %v692_v0, %v687_v1 }
 0x16a   : > { %v701_v3 = vrot.slane %v694_v2, %v1832_v31 }
 0x16b   : > { %v1056_v4 = vpop.permute.xlu1 %1055 }
 0x16c   : > { %v708_v6 = vrot.slane %v701_v3, %v1832_v31  ;;  %v1069_v11 = vrot.slane %v1056_v4, %v672_v56 }
 0x16e   : > { %v710_v20 = vadd.f32 %v708_v6, %v315_v5 }
 0x170   : > { %712 = vst.msk [vmem:[#allocation2] sm:$0x1] %vm304_vm0, %v710_v20 }
 0x171   : > { %v1059_v7 = vpop.permute.xlu1 %1058 }
 0x172   : > { %v1073_v9 = vrot.slane %v1059_v7, %v677_v53 }
 0x174   : > { %v1074_v13 = vsel %vm679_vm2, %v1073_v9, %v1069_v11 }
 0x176   : > { %v1062_v8 = vpop.permute.xlu1 %1061 }
 0x177   : > { %v1078_v10 = vrot.slane %v1062_v8, %v684_v55  ;;  %v1105_v21 = vld [vmem:[#allocation2] sm:$0x1] }
 0x178   : > { %v1106_v30 = vmul.f32 0.00390625, %v1105_v21 }
 0x179   : > { %v1079_v22 = vsel %vm686_vm3, %v1078_v10, %v1074_v13 }
 0x17b   : > { %v1065_v12 = vpop.permute.xlu1 %1064 }
 0x17c   : > { %v1083_v14 = vrot.slane %v1065_v12, %v691_v60 }
 0x17e   : > { %v1084_v15 = vsel %vm693_vm4, %v1083_v14, %v1079_v22 }
 0x17f   : > { %v1091_v16 = vrot.slane %v1084_v15, %v1832_v31 }
 0x181   : > { %v1098_v23 = vrot.slane %v1091_v16, %v1832_v31  ;;  %v1410_v31 = vld [vmem:[%s2048_s2] ss:$0 sm:$0xff] }
 0x183   : > { %v1100_v19 = vmax.f32 %v713_v18, %v1098_v23 }
 0x185   : > { %1101 = vst.msk [vmem:[#allocation3] sm:$0x1] %vm304_vm0, %v1100_v19 }
 0x18c   : > { %v1409_v33 = vld [vmem:[#allocation3] ss:$0 sm:$0xff] }
 0x18d   : > { %v1115_v24 = vsel %vm1114_vm5, %v1106_v30, %v1409_v33 }
 0x18e   : > { %1436 = vmatmul.mubr.msk.f32.vlgmr.msra.gmra.mrb[0].mxu0 %vm1129_vm6, %v1115_v24 }
 0x261   : > { %v1199_v34 = vpop.f32.mrb[0].mxu0 }
 0x262   : > { %v1200_v35 = vadd.f32 %v1410_v31, %v1199_v34  ;;  %v1437_v26 = vpop.f32.mrb[1].mxu0 }
 0x264   : > { %v1203_v27 = vmax.f32 %v1200_v35, 0.0 }
 0x266   : > { %1441 = vmatmul.mubr.msk.f32.vlgmr.msra.gmra.mrb[0].mxu1 %vm1210_vm8, %v1203_v27 }
 0x339   : > { %v1284_v36 = vpop.f32.mrb[0].mxu1 }
 0x33a   : > { %v1285_v29 = vadd.f32 %v1412_v28, %v1284_v36  ;;  %v1442_v37 = vpop.f32.mrb[1].mxu1 }
 0x33c   : > { %v1289_v32 = vrot.slane %v1285_v29, 1 }
 0x33e   : > { %v1291_v38 = vadd.f32 %v1289_v32, %v1285_v29 }
 0x340   : > { %v1415_v39 = vmul.f32 -1.442695, %v1291_v38 }
 0x342   : > { %1521 = vpow2.f32 %v1415_v39 }
 0x34c   : > { %v1522_v40 = vpop.eup %1521 }
 0x34d   : > { %v1295_v41 = vadd.f32 1.0, %v1522_v40 }
 0x34f   : > { %1523 = vrcp.f32 %v1295_v41 }
 0x359   : > { %v1524_v43 = vpop.eup %1523 }
 0x35a   : > { %v1299_v44 = vadd.f32 %v1524_v43, %v1298_v42 }
 0x35c   : > { %1300 = vst.msk [vmem:[%s295_s19] sm:$0x1] %vm304_vm0, %v1299_v44 }
 0x35d   : > { %1568 = shalt.err (!%p1565_p4)
}
 0x35e   : > { %s1569_s7 = scalar_lea.hbm %s1996_s15, 16  ;;  %s1573_s28 = scalar_lea.hbm %s2052_s6, 32 }
 0x35f   : > { %p1570_p7 = scmp.ne.s32.totalorder %s1996_s15, %s1569_s7  ;;  %p1574_p1 = scmp.lt.u32.totalorder %s1996_s15, %s2052_s6 }
 0x360   : > { %p1575_p3 = scmp.lt.u32.totalorder %s1573_s28, %s1569_s7  ;;  %p1577_p9 = scmp.lt.u32.totalorder %s1569_s7, %s1996_s15 }
 0x361   : > { %p1571_p10 = pnand %p1570_p7, %p2060_p11 }
 0x362   : > { %p1576_p8 = por %p1575_p3, %p1574_p1 }
 0x363   : > { %p1572_p12 = pneg %p1571_p10 }
 0x364   : > { %p1578_p0 = por %p1577_p9, %p1576_p8 }
 0x366   : > { %p1579_p6 = pnand %p1578_p0, %p1572_p12 }
 0x368   : > { %1582 = shalt.err (!%p1579_p6)
}
 0x369   : > { %1451 = dma.vmem_to_hbm [thread:$0]  (%p2060_p11), %s1998_s8, 16, %s1996_s15, %s1302_s16  }
 0x36a PF: > { %s1326_s30 = sand.u32 1, %s1617_s21   ;;  %p2061_p13 = scmp.ne.s32.totalorder %s2057_s12, 0 }
 0x36b   : > { %p2062_p2 = scmp.ge.s32.totalorder %s1637_s26, 2  ;;  %s1327_s14 = scalar_lea.sflag [#allocation6], %s1326_s30 }
 0x36d   : > { %p1458_p5 = pnand %p2062_p2, %p2061_p13 }
 0x36f   : > { %1612 = dma.done.wait (!%p1458_p5), %s1327_s14, 16  }
 0x370   : > { %1614 = vsyncadd (!%p1458_p5), %s1327_s14, 4294967280  ;;  %s22_s26 = sadd.s32 1, %s1637_s26   ;;  %s2063_s21 = smov %s1621_s22 }
 0x371   : > { %p19_p4 = scmp.ge.s32.totalorder %s22_s26, 4   ;;  %s2064_s22 = smov %s1625_s23 }
 0x372   : > { %s2065_s23 = smov %s1740_s11  ;;  %s2066_s24 = smov %s1633_s25 }
 0x373   : > { %s2067_s25 = smov %s2069_s29  ;;  %21 = sbr.rel (!%p19_p4) target bundleno = 6 (0x6), region = 100 }
 0x37a   :  { %1331 = vsyncpa [#allocation5], 1 }
 0x37b   :  { %1333 = vsyncpa [#allocation5 + $0x1], 1 }
 0x37c   :  { %1334 = vsyncpa [#allocation6], 1 }
 0x37d   :  { %1336 = vsyncpa [#allocation6 + $0x1], 1 }

</bundles_post_ra>
